<compile_context>
chip_gen: v7x
topology: tpu7x:2x2x1
jax: 0.10.0
libtpu: 0.0.40
codegen_flags: <defaults>
</compile_context>

<pallas_src>
import jax
import jax.numpy as jnp
from jax.experimental import pallas as pl
from jax.experimental.pallas import tpu as pltpu

LANE = 128


def _round_up(n, m=LANE):
    return ((n + m - 1) // m) * m


# ----------------------------------------------------------------------------
# Kernel
# ----------------------------------------------------------------------------
def make_rl_net_kernel(num_hidden, batch_n, eps=1e-5, matmul_dtype=jnp.float32):
    """Fused MLP kernel.

    Ref order:
      x_ref,
      [w_i, gamma_i, beta_i]  for each hidden layer i  (no hidden bias: BN cancels it),
      w_out, b_out,
      out_ref
    Weights are pre-transposed to (in_dim, out_dim) and lane-padded to 128.
    gamma/beta/b_out are (1, dim) rows for clean lane broadcasting.
    """
    inv_n = 1.0 / float(batch_n)

    def kernel(*refs):
        x_ref = refs[0]
        out_ref = refs[-1]
        params = refs[1:-1]

        x = x_ref[...].astype(matmul_dtype)
        idx = 0
        for _ in range(num_hidden):
            w_ref, g_ref, be_ref = params[idx:idx + 3]
            idx += 3
            # Linear (hidden bias omitted -- cancelled by the batch-mean subtraction).
            h = jnp.dot(x, w_ref[...], preferred_element_type=jnp.float32)
            # BatchNorm1d, training mode, one-pass stats (two back-to-back XLU
            # sublane reductions, no extra (N,H) subtract pass).
            s = jnp.sum(h, axis=0, keepdims=True)
            ss = jnp.sum(h * h, axis=0, keepdims=True)
            mean = s * inv_n
            var = jnp.maximum(ss * inv_n - mean * mean, 0.0)     # guard tiny negatives
            scale = g_ref[...] * jax.lax.rsqrt(var + eps)        # (1,H) row op, EUP rsqrt
            shift = be_ref[...] - mean * scale                   # (1,H) row op
            # Affine + ReLU in one (N,H)-wide pass.
            x = jnp.maximum(h * scale + shift, 0.0).astype(matmul_dtype)

        w_ref, b_ref = params[idx:idx + 2]
        out = jnp.dot(x, w_ref[...], preferred_element_type=jnp.float32)
        out = out + b_ref[...]
        out_ref[...] = out.astype(out_ref.dtype)

    return kernel


# ----------------------------------------------------------------------------
# One-time parameter preparation (hoisted out of the per-call hot path)
# ----------------------------------------------------------------------------
def prepare_params(params, matmul_dtype=jnp.float32):
    """Pad + cast parameters to lane-dense (multiples of 128) buffers ONCE.

    params: dict with lists 'w', 'b', 'gamma', 'beta' (hidden layers) and
    'w_out', 'b_out'.  Weights already (in_dim, out_dim).  Hidden biases 'b'
    are NOT forwarded to the kernel (training-mode BatchNorm cancels them).
    """
    num_hidden = len(params["w"])
    in_dim = params["w"][0].shape[0]
    out_dim = params["w_out"].shape[1]
    in_pad = _round_up(in_dim)

    tensors = []
    dims = []               # (padded_in, padded_out) per matmul
    cur = in_pad
    for i in range(num_hidden):
        w = params["w"][i]
        w_in, w_out_d = w.shape
        h_pad = _round_up(w_out_d)
        w_p = jnp.pad(w, ((0, cur - w_in), (0, h_pad - w_out_d))).astype(matmul_dtype)
        g_p = jnp.pad(params["gamma"][i], ((0, 0), (0, h_pad - w_out_d)),
                      constant_values=1.0)
        be_p = jnp.pad(params["beta"][i], ((0, 0), (0, h_pad - w_out_d)))
        tensors += [w_p, g_p, be_p]
        dims.append((cur, h_pad))
        cur = h_pad

    w_o = params["w_out"]
    o_pad = _round_up(out_dim)
    w_out_p = jnp.pad(
        w_o, ((0, cur - w_o.shape[0]), (0, o_pad - out_dim))).astype(matmul_dtype)
    b_out_p = jnp.pad(params["b_out"], ((0, 0), (0, o_pad - out_dim)))
    tensors += [w_out_p, b_out_p]
    dims.append((cur, o_pad))

    tensors = [jax.device_put(t) for t in tensors]
    return {
        "tensors": tensors,
        "num_hidden": num_hidden,
        "in_dim": in_dim, "in_pad": in_pad,
        "out_dim": out_dim, "out_pad": o_pad,
        "dims": dims,
        "matmul_dtype": matmul_dtype,
    }


# ----------------------------------------------------------------------------
# Forward wrappers
# ----------------------------------------------------------------------------
def rl_net_forward_groups(xg, prepared, eps=1e-5):
    """xg: (G, N, in_dim) -- G independent batches (parallel envs / rollout
    steps).  BN statistics are computed per group, i.e. identical to calling
    the PyTorch module once per group.  Weights stay VMEM-resident across the
    grid; the group axis is 'parallel' (v7x megacore)."""
    G, N, in_dim = xg.shape
    assert in_dim == prepared["in_dim"]
    in_pad = prepared["in_pad"]
    out_dim, o_pad = prepared["out_dim"], prepared["out_pad"]
    num_hidden = prepared["num_hidden"]
    mm_dtype = prepared["matmul_dtype"]
    tensors = prepared["tensors"]

    # Only the activations need per-call padding (they change every call).
    xg_p = jnp.pad(xg, ((0, 0), (0, 0), (0, in_pad - in_dim)))

    kernel = make_rl_net_kernel(num_hidden, N, eps=eps, matmul_dtype=mm_dtype)

    # Activation / output tiles move per grid step; parameters keep a constant
    # block index so Pallas keeps them resident in VMEM across all steps.
    x_spec = pl.BlockSpec((None, N, in_pad), lambda g: (g, 0, 0))
    param_specs = [pl.BlockSpec(t.shape, lambda g: (0, 0)) for t in tensors]
    out_spec = pl.BlockSpec((None, N, o_pad), lambda g: (g, 0, 0))

    # Advisory cost estimate for XLA scheduling.
    flops = 0
    for (cin, cout) in prepared["dims"][:-1]:
        flops += 2 * N * cin * cout + 10 * N * cout          # matmul + BN/ReLU
    cin, cout = prepared["dims"][-1]
    flops += 2 * N * cin * cout
    flops *= G
    transcendentals = G * sum(d[1] for d in prepared["dims"][:-1])   # rsqrt / feature
    bytes_accessed = (xg_p.size * xg_p.dtype.itemsize
                      + sum(t.size * t.dtype.itemsize for t in tensors)
                      + G * N * o_pad * 4)

    fn = pl.pallas_call(
        kernel,
        out_shape=jax.ShapeDtypeStruct((G, N, o_pad), jnp.float32),
        grid=(G,),
        in_specs=[x_spec] + param_specs,
        out_specs=out_spec,
        compiler_params=pltpu.CompilerParams(
            dimension_semantics=("parallel",),        # split groups over v7x's 2 TCs
            vmem_limit_bytes=32 * 1024 * 1024,        # safe on v5e/v6e/v7x
        ),
        cost_estimate=pl.CostEstimate(
            flops=flops,
            transcendentals=transcendentals,
            bytes_accessed=bytes_accessed,
        ),
    )
    out_padded = fn(xg_p, *tensors)
    return out_padded[:, :, :out_dim]


def rl_net_forward(x, prepared, eps=1e-5):
    """Single batch (N, in_dim) -> (N, out_dim): the G=1 case of the grid path."""
    return rl_net_forward_groups(x[None], prepared, eps=eps)[0]


# ----------------------------------------------------------------------------
# Init + pure-JAX reference (exactly the PyTorch forward, hidden biases included)
# ----------------------------------------------------------------------------
def init_params(key, input_dim, hidden_dims, output_dim=1):
    """PyTorch-style init: Linear weights/bias ~ U(-k, k), k = 1/sqrt(fan_in);
    BatchNorm gamma=1, beta=0.  Weights stored transposed as (in_dim, out_dim)."""
    params = {"w": [], "b": [], "gamma": [], "beta": []}
    cur = input_dim
    for hdim in hidden_dims:
        key, k1, k2 = jax.random.split(key, 3)
        bound = 1.0 / (cur ** 0.5)
        params["w"].append(
            jax.random.uniform(k1, (cur, hdim), jnp.float32, -bound, bound))
        params["b"].append(
            jax.random.uniform(k2, (1, hdim), jnp.float32, -bound, bound))
        params["gamma"].append(jnp.ones((1, hdim), jnp.float32))
        params["beta"].append(jnp.zeros((1, hdim), jnp.float32))
        cur = hdim
    key, k1, k2 = jax.random.split(key, 3)
    bound = 1.0 / (cur ** 0.5)
    params["w_out"] = jax.random.uniform(
        k1, (cur, output_dim), jnp.float32, -bound, bound)
    params["b_out"] = jax.random.uniform(
        k2, (1, output_dim), jnp.float32, -bound, bound)
    return params


def rl_net_reference(x, params, eps=1e-5):
    """Pure-JAX reference of the full PyTorch forward (INCLUDING hidden biases,
    which the kernel drops because training-mode BatchNorm cancels them)."""
    hp = jax.lax.Precision.HIGHEST
    h = x
    for w, b, g, be in zip(params["w"], params["b"],
                           params["gamma"], params["beta"]):
        h = jnp.dot(h, w, precision=hp) + b
        mean = jnp.mean(h, axis=0, keepdims=True)
        var = jnp.mean((h - mean) ** 2, axis=0, keepdims=True)
        h = (h - mean) / jnp.sqrt(var + eps) * g + be
        h = jnp.maximum(h, 0.0)
    return jnp.dot(h, params["w_out"], precision=hp) + params["b_out"]


if __name__ == "__main__":
    INPUT_DIM = 16
    HIDDEN_DIM = [32, 64]
    OUTPUT_DIM = 1
    BATCH = 8
    GROUPS = 4

    key = jax.random.PRNGKey(0)
    key, xkey, gkey = jax.random.split(key, 3)
    x = jax.random.normal(xkey, (BATCH, INPUT_DIM), jnp.float32)
    xg = jax.random.normal(gkey, (GROUPS, BATCH, INPUT_DIM), jnp.float32)

    params = init_params(key, INPUT_DIM, HIDDEN_DIM, OUTPUT_DIM)
    ref = rl_net_reference(x, params)

    # ---- f32 matmul path (PyTorch numerics) ----
    prepared_f32 = prepare_params(params, matmul_dtype=jnp.float32)
    out = jax.block_until_ready(rl_net_forward(x, prepared_f32))
    assert out.shape == (BATCH, OUTPUT_DIM)
    assert jnp.allclose(out, ref, atol=1e-3, rtol=1e-3)

    # ---- grid-over-groups path (weights VMEM-resident, group axis 'parallel') ----
    ref_g = jnp.stack([rl_net_reference(xg[i], params) for i in range(GROUPS)])
    out_g = jax.block_until_ready(rl_net_forward_groups(xg, prepared_f32))
    assert out_g.shape == (GROUPS, BATCH, OUTPUT_DIM)
    assert jnp.allclose(out_g, ref_g, atol=1e-3, rtol=1e-3)

    # ---- bf16 matmul-operand path (fast MXU on all generations); BN math f32 ----
    prepared_bf16 = prepare_params(params, matmul_dtype=jnp.bfloat16)
    out_bf16 = jax.block_until_ready(rl_net_forward(x, prepared_bf16))
    assert out_bf16.shape == (BATCH, OUTPUT_DIM)
    assert jnp.allclose(out_bf16, ref, atol=3e-2, rtol=3e-2)

    print("KERNEL_OK")
</pallas_src>

<mosaic_0001>
module attributes {stable_mosaic.version = 11 : i64} {
  func.func @kernel(%arg0: i32, %arg1: memref<1x8x128xf32, #tpu.memory_space<vmem>>, %arg2: memref<128x128xf32, #tpu.memory_space<vmem>>, %arg3: memref<1x128xf32, #tpu.memory_space<vmem>>, %arg4: memref<1x128xf32, #tpu.memory_space<vmem>>, %arg5: memref<128x128xf32, #tpu.memory_space<vmem>>, %arg6: memref<1x128xf32, #tpu.memory_space<vmem>>, %arg7: memref<1x128xf32, #tpu.memory_space<vmem>>, %arg8: memref<128x128xf32, #tpu.memory_space<vmem>>, %arg9: memref<1x128xf32, #tpu.memory_space<vmem>>, %arg10: memref<1x8x128xf32, #tpu.memory_space<vmem>>) attributes {dimension_semantics = [#tpu.dimension_semantics<parallel>], iteration_bounds = array<i64: 1>, scalar_prefetch = 0 : i64, scratch_operands = 0 : i64, tpu.core_type = #tpu.core_type<tc>, window_params = [{transform_indices = @transform_0, window_bounds = array<i64: 1, 8, 128>}, {pipeline_mode = #tpu.pipeline_mode<synchronous>, transform_indices = @transform_1, window_bounds = array<i64: 128, 128>}, {pipeline_mode = #tpu.pipeline_mode<synchronous>, transform_indices = @transform_2, window_bounds = array<i64: 1, 128>}, {pipeline_mode = #tpu.pipeline_mode<synchronous>, transform_indices = @transform_3, window_bounds = array<i64: 1, 128>}, {pipeline_mode = #tpu.pipeline_mode<synchronous>, transform_indices = @transform_4, window_bounds = array<i64: 128, 128>}, {pipeline_mode = #tpu.pipeline_mode<synchronous>, transform_indices = @transform_5, window_bounds = array<i64: 1, 128>}, {pipeline_mode = #tpu.pipeline_mode<synchronous>, transform_indices = @transform_6, window_bounds = array<i64: 1, 128>}, {pipeline_mode = #tpu.pipeline_mode<synchronous>, transform_indices = @transform_7, window_bounds = array<i64: 128, 128>}, {pipeline_mode = #tpu.pipeline_mode<synchronous>, transform_indices = @transform_8, window_bounds = array<i64: 1, 128>}, {transform_indices = @transform_9, window_bounds = array<i64: 1, 8, 128>}]} {
    %c0 = arith.constant 0 : index
    %c0_0 = arith.constant 0 : index
    %c0_1 = arith.constant 0 : index
    %0 = vector.load %arg1[%c0, %c0_0, %c0_1] : memref<1x8x128xf32, #tpu.memory_space<vmem>>, vector<1x8x128xf32>
    %1 = vector.shape_cast %0 : vector<1x8x128xf32> to vector<8x128xf32>
    %c0_2 = arith.constant 0 : index
    %c0_3 = arith.constant 0 : index
    %2 = vector.load %arg2[%c0_2, %c0_3] : memref<128x128xf32, #tpu.memory_space<vmem>>, vector<128x128xf32>
    %cst = arith.constant dense<0.000000e+00> : vector<8x128xf32>
    %3 = tpu.matmul %1, %2, %cst {dimension_numbers = #tpu.dot_dimension_numbers<[1], [0], [0], [1], [0, 0, 1, 1], [], []>} : vector<8x128xf32>, vector<128x128xf32>, vector<8x128xf32> -> vector<8x128xf32>
    %cst_4 = arith.constant dense<0.000000e+00> : vector<128xf32>
    %4 = vector.multi_reduction <add>, %3, %cst_4 [0] : vector<8x128xf32> to vector<128xf32>
    %5 = vector.shape_cast %4 : vector<128xf32> to vector<1x128xf32>
    %6 = arith.mulf %3, %3 : vector<8x128xf32>
    %cst_5 = arith.constant dense<0.000000e+00> : vector<128xf32>
    %7 = vector.multi_reduction <add>, %6, %cst_5 [0] : vector<8x128xf32> to vector<128xf32>
    %8 = vector.shape_cast %7 : vector<128xf32> to vector<1x128xf32>
    %cst_6 = arith.constant 1.250000e-01 : f32
    %9 = vector.broadcast %cst_6 : f32 to vector<1x128xf32>
    %10 = arith.mulf %5, %9 : vector<1x128xf32>
    %cst_7 = arith.constant 1.250000e-01 : f32
    %11 = vector.broadcast %cst_7 : f32 to vector<1x128xf32>
    %12 = arith.mulf %8, %11 : vector<1x128xf32>
    %13 = arith.mulf %10, %10 : vector<1x128xf32>
    %14 = arith.subf %12, %13 : vector<1x128xf32>
    %cst_8 = arith.constant 0.000000e+00 : f32
    %15 = vector.broadcast %cst_8 : f32 to vector<1x128xf32>
    %16 = arith.maximumf %14, %15 : vector<1x128xf32>
    %c0_9 = arith.constant 0 : index
    %c0_10 = arith.constant 0 : index
    %17 = vector.load %arg3[%c0_9, %c0_10] : memref<1x128xf32, #tpu.memory_space<vmem>>, vector<1x128xf32>
    %cst_11 = arith.constant 9.99999974E-6 : f32
    %18 = vector.broadcast %cst_11 : f32 to vector<1x128xf32>
    %19 = arith.addf %16, %18 : vector<1x128xf32>
    %20 = math.rsqrt %19 : vector<1x128xf32>
    %21 = arith.mulf %17, %20 : vector<1x128xf32>
    %c0_12 = arith.constant 0 : index
    %c0_13 = arith.constant 0 : index
    %22 = vector.load %arg4[%c0_12, %c0_13] : memref<1x128xf32, #tpu.memory_space<vmem>>, vector<1x128xf32>
    %23 = arith.mulf %10, %21 : vector<1x128xf32>
    %24 = arith.subf %22, %23 : vector<1x128xf32>
    %25 = vector.broadcast %21 : vector<1x128xf32> to vector<8x128xf32>
    %26 = arith.mulf %3, %25 : vector<8x128xf32>
    %27 = vector.broadcast %24 : vector<1x128xf32> to vector<8x128xf32>
    %28 = arith.addf %26, %27 : vector<8x128xf32>
    %cst_14 = arith.constant 0.000000e+00 : f32
    %29 = vector.broadcast %cst_14 : f32 to vector<8x128xf32>
    %30 = arith.maximumf %28, %29 : vector<8x128xf32>
    %c0_15 = arith.constant 0 : index
    %c0_16 = arith.constant 0 : index
    %31 = vector.load %arg5[%c0_15, %c0_16] : memref<128x128xf32, #tpu.memory_space<vmem>>, vector<128x128xf32>
    %cst_17 = arith.constant dense<0.000000e+00> : vector<8x128xf32>
    %32 = tpu.matmul %30, %31, %cst_17 {dimension_numbers = #tpu.dot_dimension_numbers<[1], [0], [0], [1], [0, 0, 1, 1], [], []>} : vector<8x128xf32>, vector<128x128xf32>, vector<8x128xf32> -> vector<8x128xf32>
    %cst_18 = arith.constant dense<0.000000e+00> : vector<128xf32>
    %33 = vector.multi_reduction <add>, %32, %cst_18 [0] : vector<8x128xf32> to vector<128xf32>
    %34 = vector.shape_cast %33 : vector<128xf32> to vector<1x128xf32>
    %35 = arith.mulf %32, %32 : vector<8x128xf32>
    %cst_19 = arith.constant dense<0.000000e+00> : vector<128xf32>
    %36 = vector.multi_reduction <add>, %35, %cst_19 [0] : vector<8x128xf32> to vector<128xf32>
    %37 = vector.shape_cast %36 : vector<128xf32> to vector<1x128xf32>
    %cst_20 = arith.constant 1.250000e-01 : f32
    %38 = vector.broadcast %cst_20 : f32 to vector<1x128xf32>
    %39 = arith.mulf %34, %38 : vector<1x128xf32>
    %cst_21 = arith.constant 1.250000e-01 : f32
    %40 = vector.broadcast %cst_21 : f32 to vector<1x128xf32>
    %41 = arith.mulf %37, %40 : vector<1x128xf32>
    %42 = arith.mulf %39, %39 : vector<1x128xf32>
    %43 = arith.subf %41, %42 : vector<1x128xf32>
    %cst_22 = arith.constant 0.000000e+00 : f32
    %44 = vector.broadcast %cst_22 : f32 to vector<1x128xf32>
    %45 = arith.maximumf %43, %44 : vector<1x128xf32>
    %c0_23 = arith.constant 0 : index
    %c0_24 = arith.constant 0 : index
    %46 = vector.load %arg6[%c0_23, %c0_24] : memref<1x128xf32, #tpu.memory_space<vmem>>, vector<1x128xf32>
    %cst_25 = arith.constant 9.99999974E-6 : f32
    %47 = vector.broadcast %cst_25 : f32 to vector<1x128xf32>
    %48 = arith.addf %45, %47 : vector<1x128xf32>
    %49 = math.rsqrt %48 : vector<1x128xf32>
    %50 = arith.mulf %46, %49 : vector<1x128xf32>
    %c0_26 = arith.constant 0 : index
    %c0_27 = arith.constant 0 : index
    %51 = vector.load %arg7[%c0_26, %c0_27] : memref<1x128xf32, #tpu.memory_space<vmem>>, vector<1x128xf32>
    %52 = arith.mulf %39, %50 : vector<1x128xf32>
    %53 = arith.subf %51, %52 : vector<1x128xf32>
    %54 = vector.broadcast %50 : vector<1x128xf32> to vector<8x128xf32>
    %55 = arith.mulf %32, %54 : vector<8x128xf32>
    %56 = vector.broadcast %53 : vector<1x128xf32> to vector<8x128xf32>
    %57 = arith.addf %55, %56 : vector<8x128xf32>
    %cst_28 = arith.constant 0.000000e+00 : f32
    %58 = vector.broadcast %cst_28 : f32 to vector<8x128xf32>
    %59 = arith.maximumf %57, %58 : vector<8x128xf32>
    %c0_29 = arith.constant 0 : index
    %c0_30 = arith.constant 0 : index
    %60 = vector.load %arg8[%c0_29, %c0_30] : memref<128x128xf32, #tpu.memory_space<vmem>>, vector<128x128xf32>
    %cst_31 = arith.constant dense<0.000000e+00> : vector<8x128xf32>
    %61 = tpu.matmul %59, %60, %cst_31 {dimension_numbers = #tpu.dot_dimension_numbers<[1], [0], [0], [1], [0, 0, 1, 1], [], []>} : vector<8x128xf32>, vector<128x128xf32>, vector<8x128xf32> -> vector<8x128xf32>
    %c0_32 = arith.constant 0 : index
    %c0_33 = arith.constant 0 : index
    %62 = vector.load %arg9[%c0_32, %c0_33] : memref<1x128xf32, #tpu.memory_space<vmem>>, vector<1x128xf32>
    %63 = vector.broadcast %62 : vector<1x128xf32> to vector<8x128xf32>
    %64 = arith.addf %61, %63 : vector<8x128xf32>
    %c0_34 = arith.constant 0 : index
    %c0_35 = arith.constant 0 : index
    %c0_36 = arith.constant 0 : index
    %65 = vector.load %arg10[%c0_34, %c0_35, %c0_36] : memref<1x8x128xf32, #tpu.memory_space<vmem>>, vector<1x8x128xf32>
    %66 = vector.shape_cast %65 : vector<1x8x128xf32> to vector<8x128xf32>
    %67 = vector.shape_cast %64 : vector<8x128xf32> to vector<1x8x128xf32>
    tpu.vector_store %arg10[%c0_34, %c0_35, %c0_36], %67 {strides = array<i32>} : memref<1x8x128xf32, #tpu.memory_space<vmem>>, vector<1x8x128xf32>,
    return
  }
  func.func @transform_0(%arg0: i32) -> (i32, i32, i32) {
    %c0_i32 = arith.constant 0 : i32
    %c0_i32_0 = arith.constant 0 : i32
    %c0_i32_1 = arith.constant 0 : i32
    return %arg0, %c0_i32, %c0_i32_0 : i32, i32, i32
  }
  func.func @transform_1(%arg0: i32) -> (i32, i32) {
    %c0_i32 = arith.constant 0 : i32
    %c0_i32_0 = arith.constant 0 : i32
    %c0_i32_1 = arith.constant 0 : i32
    return %c0_i32, %c0_i32_0 : i32, i32
  }
  func.func @transform_2(%arg0: i32) -> (i32, i32) {
    %c0_i32 = arith.constant 0 : i32
    %c0_i32_0 = arith.constant 0 : i32
    %c0_i32_1 = arith.constant 0 : i32
    return %c0_i32, %c0_i32_0 : i32, i32
  }
  func.func @transform_3(%arg0: i32) -> (i32, i32) {
    %c0_i32 = arith.constant 0 : i32
    %c0_i32_0 = arith.constant 0 : i32
    %c0_i32_1 = arith.constant 0 : i32
    return %c0_i32, %c0_i32_0 : i32, i32
  }
  func.func @transform_4(%arg0: i32) -> (i32, i32) {
    %c0_i32 = arith.constant 0 : i32
    %c0_i32_0 = arith.constant 0 : i32
    %c0_i32_1 = arith.constant 0 : i32
    return %c0_i32, %c0_i32_0 : i32, i32
  }
  func.func @transform_5(%arg0: i32) -> (i32, i32) {
    %c0_i32 = arith.constant 0 : i32
    %c0_i32_0 = arith.constant 0 : i32
    %c0_i32_1 = arith.constant 0 : i32
    return %c0_i32, %c0_i32_0 : i32, i32
  }
  func.func @transform_6(%arg0: i32) -> (i32, i32) {
    %c0_i32 = arith.constant 0 : i32
    %c0_i32_0 = arith.constant 0 : i32
    %c0_i32_1 = arith.constant 0 : i32
    return %c0_i32, %c0_i32_0 : i32, i32
  }
  func.func @transform_7(%arg0: i32) -> (i32, i32) {
    %c0_i32 = arith.constant 0 : i32
    %c0_i32_0 = arith.constant 0 : i32
    %c0_i32_1 = arith.constant 0 : i32
    return %c0_i32, %c0_i32_0 : i32, i32
  }
  func.func @transform_8(%arg0: i32) -> (i32, i32) {
    %c0_i32 = arith.constant 0 : i32
    %c0_i32_0 = arith.constant 0 : i32
    %c0_i32_1 = arith.constant 0 : i32
    return %c0_i32, %c0_i32_0 : i32, i32
  }
  func.func @transform_9(%arg0: i32) -> (i32, i32, i32) {
    %c0_i32 = arith.constant 0 : i32
    %c0_i32_0 = arith.constant 0 : i32
    %c0_i32_1 = arith.constant 0 : i32
    return %arg0, %c0_i32, %c0_i32_0 : i32, i32, i32
  }
}

</mosaic_0001>

<bundles_post_ra>
// kernel: tpu_custom_call.1
= control target key start
LH: loop header
LB: loop body
LE: loop exit
PB: predicated region body
PF: predicated region fallthrough
CT: control target
= control target key end

     0   :  { %14 = vsyncpa [#allocation3], 0  ;;  %s988_s0 = inlined_call_operand.hbm [shape: f32[1,8,128], index: 0, kind: input, shape index: {}]   ;;  %s989_s1 = inlined_call_operand.hbm [shape: f32[128,128], index: 1, kind: input, shape index: {}]   ;;  %s990_s2 = inlined_call_operand.vmem [shape: f32[1,128], index: 2, kind: input, shape index: {}]   ;;  %s991_s3 = inlined_call_operand.vmem [shape: f32[1,128], index: 3, kind: input, shape index: {}]   ;;  %s992_s4 = inlined_call_operand.hbm [shape: f32[128,128], index: 4, kind: input, shape index: {}]   ;;  %s993_s5 = inlined_call_operand.vmem [shape: f32[1,128], index: 5, kind: input, shape index: {}]   ;;  %s994_s6 = inlined_call_operand.vmem [shape: f32[1,128], index: 6, kind: input, shape index: {}]   ;;  %s995_s7 = inlined_call_operand.hbm [shape: f32[128,128], index: 7, kind: input, shape index: {}]   ;;  %s996_s8 = inlined_call_operand.vmem [shape: f32[1,128], index: 8, kind: input, shape index: {}]   ;;  %s997_s9 = inlined_call_operand.hbm [shape: f32[1,8,128], index: 9, kind: output, shape index: {}]  }
   0x1   :  { %15 = vsyncpa [#allocation6], 0 }
   0x2   :  { %16 = vsyncpa [#allocation9], 0 }
   0x3   :  { %17 = vsyncpa [#allocation4], 0  ;;  %s811_s30 = smov [#allocation5]   ;;  %s693_s13 = scalar_lea.hbm %s989_s1, 2048 }
   0x4   :  { %s33_s10 = sshll.u32 %s811_s30, 4  ;;  %p694_p0 = scmp.ne.s32.totalorder %s989_s1, %s693_s13  ;;  %s34_s10 = int_to_ptr.vmem [resolvable:$true] %s33_s10 }
   0x5   :  { %p697_p1 = scmp.lt.u32.totalorder %s693_s13, %s989_s1 }
   0x7   :  { %p699_p2 = pnand %p697_p1, %p694_p0 }
   0x9   :  { %702 = shalt.err (!%p699_p2)
}
   0xa   :  { %s703_s18 = scalar_lea.vmem %s34_s10, 2048  ;;  %p708_p4 = scmp.lt.s32.totalorder %s34_s10, %s34_s10 }
   0xb   :  { %p704_p3 = scmp.ne.s32.totalorder %s34_s10, %s703_s18  ;;  %p709_p5 = scmp.lt.s32.totalorder %s703_s18, %s703_s18 }
   0xd   :  { %p710_p6 = por %p709_p5, %p708_p4 }
   0xf   :  { %p711_p7 = pnand %p710_p6, %p704_p3 }
  0x11   :  { %714 = shalt.err (!%p711_p7)
}
  0x12   :  { %s812_s19 = smov 128   ;;  %s813_s20 = smov 8  }
  0x13   :  { %39 = dma.hbm_to_vmem [thread:$0]  %s989_s1, 2048, %s34_s10, [#allocation6], %s812_s19, %s812_s19, %s813_s20  }
  0x14   :  { %s814_s23 = smov [#allocation2]   ;;  %s815_s25 = smov [#allocation7]  }
  0x15   :  { %s24_s24 = sshll.u32 %s814_s23, 4  ;;  %s49_s26 = sshll.u32 %s815_s25, 4  ;;  %s25_s24 = int_to_ptr.vmem [resolvable:$true] %s24_s24  ;;  %s50_s26 = int_to_ptr.vmem [resolvable:$true] %s49_s26 }
  0x16   :  { %s715_s29 = scalar_lea.hbm %s988_s0, 128 }
  0x17   :  { %p716_p8 = scmp.ne.s32.totalorder %s988_s0, %s715_s29  ;;  %p719_p9 = scmp.lt.u32.totalorder %s715_s29, %s988_s0 }
  0x19   :  { %p721_p10 = pnand %p719_p9, %p716_p8 }
  0x1b   :  { %724 = shalt.err (!%p721_p10)
}
  0x1c   :  { %s725_s1 = scalar_lea.vmem %s25_s24, 128  ;;  %p730_p12 = scmp.lt.s32.totalorder %s25_s24, %s25_s24 }
  0x1d   :  { %p726_p11 = scmp.ne.s32.totalorder %s25_s24, %s725_s1  ;;  %p731_p13 = scmp.lt.s32.totalorder %s725_s1, %s725_s1 }
  0x1f   :  { %p732_p0 = por %p731_p13, %p730_p12 }
  0x21   :  { %p733_p1 = pnand %p732_p0, %p726_p11 }
  0x23   :  { %736 = shalt.err (!%p733_p1)
}
  0x24   :  { %27 = dma.hbm_to_vmem [thread:$0]  %s988_s0, 128, %s25_s24, [#allocation3]  }
  0x25   :  { %s737_s17 = scalar_lea.hbm %s992_s4, 2048 }
  0x26   :  { %p738_p2 = scmp.ne.s32.totalorder %s992_s4, %s737_s17  ;;  %p741_p3 = scmp.lt.u32.totalorder %s737_s17, %s992_s4 }
  0x28   :  { %p743_p4 = pnand %p741_p3, %p738_p2 }
  0x2a   :  { %746 = shalt.err (!%p743_p4)
}
  0x2b   :  { %s747_s25 = scalar_lea.vmem %s50_s26, 2048  ;;  %p752_p6 = scmp.lt.s32.totalorder %s50_s26, %s50_s26 }
  0x2c   :  { %p748_p5 = scmp.ne.s32.totalorder %s50_s26, %s747_s25  ;;  %p753_p7 = scmp.lt.s32.totalorder %s747_s25, %s747_s25 }
  0x2e   :  { %p754_p8 = por %p753_p7, %p752_p6 }
  0x30   :  { %p755_p9 = pnand %p754_p8, %p748_p5 }
  0x32   :  { %758 = shalt.err (!%p755_p9)
}
  0x33   :  { %55 = dma.hbm_to_vmem [thread:$0]  %s992_s4, 2048, %s50_s26, [#allocation6], %s812_s19, %s812_s19, %s813_s20  }
  0x34   :  { %s816_s27 = smov [#allocation8]   ;;  %s759_s11 = scalar_lea.hbm %s995_s7, 2048 }
  0x35   :  { %s65_s28 = sshll.u32 %s816_s27, 4  ;;  %p760_p10 = scmp.ne.s32.totalorder %s995_s7, %s759_s11  ;;  %s66_s28 = int_to_ptr.vmem [resolvable:$true] %s65_s28 }
  0x36   :  { %p763_p11 = scmp.lt.u32.totalorder %s759_s11, %s995_s7 }
  0x38   :  { %p765_p12 = pnand %p763_p11, %p760_p10 }
  0x3a   :  { %768 = shalt.err (!%p765_p12)
}
  0x3b   :  { %s769_s14 = scalar_lea.vmem %s66_s28, 2048  ;;  %p774_p0 = scmp.lt.s32.totalorder %s66_s28, %s66_s28 }
  0x3c   :  { %p770_p13 = scmp.ne.s32.totalorder %s66_s28, %s769_s14  ;;  %p775_p1 = scmp.lt.s32.totalorder %s769_s14, %s769_s14 }
  0x3e   :  { %p776_p2 = por %p775_p1, %p774_p0 }
  0x40   :  { %p777_p3 = pnand %p776_p2, %p770_p13 }
  0x42   :  { %780 = shalt.err (!%p777_p3)
}
  0x43   :  { %71 = dma.hbm_to_vmem [thread:$0]  %s995_s7, 2048, %s66_s28, [#allocation9], %s812_s19, %s812_s19, %s813_s20  }
  0x44   :  { %803 = dma.done.wait [#allocation3], 128  }
  0x45   :  { %804 = vsyncadd [#allocation3], 4294967168 }
  0x46   :  { %805 = dma.done.wait [#allocation6], 4096  }
  0x47   :  { %806 = vsyncadd [#allocation6], 4294963200 }
  0x48   :  { %807 = dma.done.wait [#allocation9], 2048  }
  0x49   :  { %808 = vsyncadd [#allocation9], 4294965248  ;;  %v817_v0 = vmov 0.0|0.0   ;;  %vm818_vm0 = vmmov 0   ;;  %v819_v1 = vmov 0.0   ;;  %v87_v2 = vld [vmem:[#allocation5] sm:$0xff] }
  0x4a   :  { %607 = vmatprep.subr.bf16.mxu0 %v817_v0  ;;  %534 = vmatprep.mubr.msk.f32.mxu0 %vm818_vm0, %v819_v1  ;;  %v88_v3 = vld [vmem:[#allocation5 + $0x8] sm:$0xff]  ;;  %v89_v4 = vld [vmem:[#allocation5 + $0x10] sm:$0xff]  ;;  %v90_v6 = vld [vmem:[#allocation5 + $0x18] sm:$0xff] }
  0x4b   :  { %631 = vmatprep.subr.bf16.mxu1 %v817_v0  ;;  %569 = vmatprep.mubr.msk.f32.mxu1 %vm818_vm0, %v819_v1  ;;  %v608_v5 = vpack.c.bf16 %v88_v3, %v87_v2  ;;  %v611_v7 = vpack.c.bf16 %v90_v6, %v89_v4  ;;  %v91_v8 = vld [vmem:[#allocation5 + $0x20] sm:$0xff]  ;;  %v92_v9 = vld [vmem:[#allocation5 + $0x28] sm:$0xff]  ;;  %v93_v11 = vld [vmem:[#allocation5 + $0x30] sm:$0xff] }
  0x4c   :  { %v614_v10 = vpack.c.bf16 %v92_v9, %v91_v8  ;;  %v94_v12 = vld [vmem:[#allocation5 + $0x38] sm:$0xff]  ;;  %v95_v14 = vld [vmem:[#allocation5 + $0x40] sm:$0xff]  ;;  %v96_v15 = vld [vmem:[#allocation5 + $0x48] sm:$0xff]  ;;  %v199_v9 = vlaneseq }
  0x4d   :  { %609 = vmatpush3.bf16.msra.mxu0 %v608_v5  ;;  %v617_v13 = vpack.c.bf16 %v94_v12, %v93_v11  ;;  %v620_v16 = vpack.c.bf16 %v96_v15, %v95_v14  ;;  %v97_v17 = vld [vmem:[#allocation5 + $0x50] sm:$0xff]  ;;  %v98_v18 = vld [vmem:[#allocation5 + $0x58] sm:$0xff]  ;;  %v99_v20 = vld [vmem:[#allocation5 + $0x60] sm:$0xff] }
  0x4e   :  { %610 = vmatprep.subr.bf16.mxu0 %v817_v0  ;;  %v623_v19 = vpack.c.bf16 %v98_v18, %v97_v17  ;;  %v100_v21 = vld [vmem:[#allocation5 + $0x68] sm:$0xff]  ;;  %v101_v23 = vld [vmem:[#allocation5 + $0x70] sm:$0xff]  ;;  %v102_v24 = vld [vmem:[#allocation5 + $0x78] sm:$0xff] }
  0x4f   :  { %v626_v22 = vpack.c.bf16 %v100_v21, %v99_v20  ;;  %v629_v25 = vpack.c.bf16 %v102_v24, %v101_v23  ;;  %v86_v26 = vld [vmem:[#allocation2] sm:$0xff]  ;;  %v213_v27 = vld [vmem:[#allocation7] sm:$0xff]  ;;  %v214_v28 = vld [vmem:[#allocation7 + $0x8] sm:$0xff] }
  0x50   :  { %v632_v29 = vpack.c.bf16 %v214_v28, %v213_v27  ;;  %v215_v30 = vld [vmem:[#allocation7 + $0x10] sm:$0xff]  ;;  %v216_v31 = vld [vmem:[#allocation7 + $0x18] sm:$0xff]  ;;  %v217_v33 = vld [vmem:[#allocation7 + $0x20] sm:$0xff] }
  0x51   :  { %612 = vmatpush3.bf16.msra.mxu0 %v611_v7  ;;  %v635_v32 = vpack.c.bf16 %v216_v31, %v215_v30  ;;  %v218_v34 = vld [vmem:[#allocation7 + $0x28] sm:$0xff]  ;;  %v219_v36 = vld [vmem:[#allocation7 + $0x30] sm:$0xff]  ;;  %v220_v37 = vld [vmem:[#allocation7 + $0x38] sm:$0xff] }
  0x52   :  { %613 = vmatprep.subr.bf16.mxu0 %v817_v0  ;;  %633 = vmatpush3.bf16.msra.mxu1 %v632_v29  ;;  %v638_v35 = vpack.c.bf16 %v218_v34, %v217_v33  ;;  %v641_v38 = vpack.c.bf16 %v220_v37, %v219_v36  ;;  %v221_v39 = vld [vmem:[#allocation7 + $0x40] sm:$0xff]  ;;  %v222_v40 = vld [vmem:[#allocation7 + $0x48] sm:$0xff]  ;;  %v223_v42 = vld [vmem:[#allocation7 + $0x50] sm:$0xff] }
  0x53   :  { %634 = vmatprep.subr.bf16.mxu1 %v817_v0  ;;  %v644_v41 = vpack.c.bf16 %v222_v40, %v221_v39  ;;  %v224_v43 = vld [vmem:[#allocation7 + $0x58] sm:$0xff]  ;;  %v225_v45 = vld [vmem:[#allocation7 + $0x60] sm:$0xff]  ;;  %v226_v46 = vld [vmem:[#allocation7 + $0x68] sm:$0xff] }
  0x54   :  { %v647_v44 = vpack.c.bf16 %v224_v43, %v223_v42  ;;  %v650_v47 = vpack.c.bf16 %v226_v46, %v225_v45  ;;  %v227_v48 = vld [vmem:[#allocation7 + $0x70] sm:$0xff]  ;;  %v228_v49 = vld [vmem:[#allocation7 + $0x78] sm:$0xff]  ;;  %v339_v23 = vld [vmem:[#allocation8] sm:$0xff] }
  0x55   :  { %615 = vmatpush3.bf16.msra.mxu0 %v614_v10  ;;  %v653_v50 = vpack.c.bf16 %v228_v49, %v227_v48  ;;  %v200_v10 = vshrl.u32 %v199_v9, 7  ;;  %v191_v11 = vld [vmem:[%s990_s2] sm:$0x1]  ;;  %v340_v24 = vld [vmem:[#allocation8 + $0x8] sm:$0xff]  ;;  %v343_v29 = vld [vmem:[#allocation8 + $0x20] sm:$0xff] }
  0x56   :  { %616 = vmatprep.subr.bf16.mxu0 %v817_v0  ;;  %636 = vmatpush3.bf16.msra.mxu1 %v635_v32  ;;  %v195_v15 = vld [vmem:[%s991_s3] sm:$0x1]  ;;  %v344_v30 = vld [vmem:[#allocation8 + $0x28] sm:$0xff]  ;;  %v345_v32 = vld [vmem:[#allocation8 + $0x30] sm:$0xff] }
  0x57   :  { %637 = vmatprep.subr.bf16.mxu1 %v817_v0  ;;  %v951_v12 = vsub.s32 0, %v200_v10  ;;  %v342_v27 = vld [vmem:[#allocation8 + $0x18] sm:$0xff]  ;;  %v662_v31 = vpack.c.bf16 %v344_v30, %v343_v29  ;;  %v348_v36 = vld [vmem:[#allocation8 + $0x48] sm:$0xff] }
  0x58   :  { %v346_v33 = vld [vmem:[#allocation8 + $0x38] sm:$0xff]  ;;  %v352_v42 = vld [vmem:[#allocation8 + $0x68] sm:$0xff] }
  0x59   :  { %618 = vmatpush3.bf16.msra.mxu0 %v617_v13  ;;  %v665_v34 = vpack.c.bf16 %v346_v33, %v345_v32  ;;  %v350_v39 = vld [vmem:[#allocation8 + $0x58] sm:$0xff] }
  0x5a   :  { %619 = vmatprep.subr.bf16.mxu0 %v817_v0  ;;  %639 = vmatpush3.bf16.msra.mxu1 %v638_v35  ;;  %v347_v35 = vld [vmem:[#allocation8 + $0x40] sm:$0xff]  ;;  %v354_v45 = vld [vmem:[#allocation8 + $0x78] sm:$0xff] }
  0x5b   :  { %640 = vmatprep.subr.bf16.mxu1 %v817_v0  ;;  %v668_v37 = vpack.c.bf16 %v348_v36, %v347_v35 }
  0x5d   :  { %621 = vmatpush3.bf16.msra.mxu0 %v620_v16 }
  0x5e   :  { %622 = vmatprep.subr.bf16.mxu0 %v817_v0  ;;  %642 = vmatpush3.bf16.msra.mxu1 %v641_v38  ;;  %v349_v38 = vld [vmem:[#allocation8 + $0x50] sm:$0xff] }
  0x5f   :  { %643 = vmatprep.subr.bf16.mxu1 %v817_v0  ;;  %v671_v40 = vpack.c.bf16 %v350_v39, %v349_v38 }
  0x61   :  { %624 = vmatpush3.bf16.msra.mxu0 %v623_v19 }
  0x62   :  { %625 = vmatprep.subr.bf16.mxu0 %v817_v0  ;;  %645 = vmatpush3.bf16.msra.mxu1 %v644_v41  ;;  %v351_v41 = vld [vmem:[#allocation8 + $0x60] sm:$0xff] }
  0x63   :  { %646 = vmatprep.subr.bf16.mxu1 %v817_v0  ;;  %v674_v43 = vpack.c.bf16 %v352_v42, %v351_v41 }
  0x65   :  { %627 = vmatpush3.bf16.msra.mxu0 %v626_v22 }
  0x66   :  { %628 = vmatprep.subr.bf16.mxu0 %v817_v0  ;;  %648 = vmatpush3.bf16.msra.mxu1 %v647_v44  ;;  %v353_v44 = vld [vmem:[#allocation8 + $0x70] sm:$0xff] }
  0x67   :  { %649 = vmatprep.subr.bf16.mxu1 %v817_v0  ;;  %v677_v46 = vpack.c.bf16 %v354_v45, %v353_v44 }
  0x69   :  { %630 = vmatpush3.bf16.msra.mxu0 %v629_v25  ;;  %v656_v25 = vpack.c.bf16 %v340_v24, %v339_v23 }
  0x6a   :  { %655 = vmatprep.subr.bf16.mxu0 %v817_v0  ;;  %651 = vmatpush3.bf16.msra.mxu1 %v650_v47 }
  0x6b   :  { %652 = vmatprep.subr.bf16.mxu1 %v817_v0 }
  0x6c   :  { %535 = vmatmul.mubr.f32.vlgmr.msra.gmra.mrb[0].mxu0 %v86_v26  ;;  %v341_v26 = vld [vmem:[#allocation8 + $0x10] sm:$0xff] }
  0x6d   :  { %604 = vmatprep.mubr.msk.f32.mxu0 %vm818_vm0, %v819_v1  ;;  %657 = vmatpush3.bf16.msra.mxu0 %v656_v25  ;;  %v659_v28 = vpack.c.bf16 %v342_v27, %v341_v26 }
  0x6e   :  { %654 = vmatpush3.bf16.msra.mxu1 %v653_v50  ;;  %658 = vmatprep.subr.bf16.mxu0 %v817_v0 }
  0x71   :  { %660 = vmatpush3.bf16.msra.mxu0 %v659_v28 }
  0x72   :  { %661 = vmatprep.subr.bf16.mxu0 %v817_v0 }
  0x75   :  { %663 = vmatpush3.bf16.msra.mxu0 %v662_v31 }
  0x76   :  { %664 = vmatprep.subr.bf16.mxu0 %v817_v0 }
  0x79   :  { %666 = vmatpush3.bf16.msra.mxu0 %v665_v34 }
  0x7a   :  { %667 = vmatprep.subr.bf16.mxu0 %v817_v0 }
  0x7d   :  { %669 = vmatpush3.bf16.msra.mxu0 %v668_v37 }
  0x7e   :  { %670 = vmatprep.subr.bf16.mxu0 %v817_v0 }
  0x81   :  { %672 = vmatpush3.bf16.msra.mxu0 %v671_v40 }
  0x82   :  { %673 = vmatprep.subr.bf16.mxu0 %v817_v0 }
  0x85   :  { %675 = vmatpush3.bf16.msra.mxu0 %v674_v43 }
  0x86   :  { %676 = vmatprep.subr.bf16.mxu0 %v817_v0 }
  0x89   :  { %678 = vmatpush3.bf16.msra.mxu0 %v677_v46 }
 0x13f   :  { %v169_v51 = vpop.f32.mrb[0].mxu0 }
 0x140   :  { %v173_v52 = vrot.slane %v169_v51, 4  ;;  %v179_v53 = vmul.f32 %v169_v51, %v169_v51  ;;  %v536_v54 = vpop.f32.mrb[1].mxu0 }
 0x142   :  { %v174_v55 = vadd.f32 %v173_v52, %v169_v51  ;;  %v180_v56 = vrot.slane %v179_v53, 4 }
 0x144   :  { %v175_v57 = vrot.slane %v174_v55, 2  ;;  %v181_v58 = vadd.f32 %v180_v56, %v179_v53 }
 0x146   :  { %v176_v59 = vadd.f32 %v175_v57, %v174_v55  ;;  %v182_v60 = vrot.slane %v181_v58, 2 }
 0x148   :  { %v177_v61 = vrot.slane %v176_v59, 1  ;;  %v183_v62 = vadd.f32 %v182_v60, %v181_v58 }
 0x14a   :  { %v178_v63 = vadd.f32 %v177_v61, %v176_v59  ;;  %v184_v1 = vrot.slane %v183_v62, 1 }
 0x14c   :  { %v185_v2 = vadd.f32 %v184_v1, %v183_v62  ;;  %v186_v3 = vmul.f32 0.125, %v178_v63 }
 0x14e   :  { %v187_v4 = vmul.f32 0.125, %v185_v2  ;;  %v188_v5 = vmul.f32 %v186_v3, %v186_v3 }
 0x150   :  { %v189_v6 = vsub.f32 %v187_v4, %v188_v5  ;;  %v317_v4 = vld [vmem:[%s993_s5] sm:$0x1]  ;;  %s820_s5 = smov [#allocation10]  }
 0x151   :  { %s439_s22 = sshll.u32 %s820_s5, 4  ;;  %s440_s22 = int_to_ptr.vmem [resolvable:$true] %s439_s22 }
 0x152   :  { %v190_v7 = vmax.f32 %v189_v6, 0.0  ;;  %p786_p5 = scmp.lt.s32.totalorder %s440_s22, %s440_s22 }
 0x154   :  { %v192_v8 = vadd.f32 1e-05, %v190_v7  ;;  %v321_v7 = vld [vmem:[%s994_s6] sm:$0x1]  ;;  %s781_s6 = scalar_lea.vmem %s440_s22, 128 }
 0x155   :  { %p782_p4 = scmp.ne.s32.totalorder %s440_s22, %s781_s6  ;;  %p787_p6 = scmp.lt.s32.totalorder %s781_s6, %s781_s6 }
 0x156   :  { %689 = vrsqrt.f32 %v192_v8 }
 0x157   :  { %p788_p7 = por %p787_p6, %p786_p5 }
 0x159   :  { %p789_p8 = pnand %p788_p7, %p782_p4 }
 0x160   :  { %v690_v13 = vpop.eup %689 }
 0x161   :  { %v194_v14 = vmul.f32 %v690_v13, %v191_v11 }
 0x163   :  { %v202_v16 = vrot.slane %v194_v14, %v951_v12  ;;  %v196_v17 = vmul.f32 %v194_v14, %v186_v3 }
 0x165   :  { %v197_v18 = vsub.f32 %v195_v15, %v196_v17  ;;  %v204_v19 = vmul.f32 %v202_v16, %v169_v51  ;;  %v450_v16 = vld [vmem:[%s996_s8] ss:$0 sm:$0xff] }
 0x167   :  { %v209_v20 = vrot.slane %v197_v18, %v951_v12 }
 0x169   :  { %v211_v21 = vadd.f32 %v209_v20, %v204_v19 }
 0x16b   :  { %v212_v22 = vmax.f32 %v211_v21, 0.0 }
 0x16d   :  { %570 = vmatmul.mubr.f32.vlgmr.msra.gmra.mrb[0].mxu1 %v212_v22 }
 0x240   :  { %v295_v47 = vpop.f32.mrb[0].mxu1 }
 0x241   :  { %v299_v48 = vrot.slane %v295_v47, 4  ;;  %v305_v49 = vmul.f32 %v295_v47, %v295_v47  ;;  %v571_v50 = vpop.f32.mrb[1].mxu1 }
 0x243   :  { %v300_v51 = vadd.f32 %v299_v48, %v295_v47  ;;  %v306_v52 = vrot.slane %v305_v49, 4 }
 0x245   :  { %v301_v53 = vrot.slane %v300_v51, 2  ;;  %v307_v54 = vadd.f32 %v306_v52, %v305_v49 }
 0x247   :  { %v302_v55 = vadd.f32 %v301_v53, %v300_v51  ;;  %v308_v56 = vrot.slane %v307_v54, 2 }
 0x249   :  { %v303_v57 = vrot.slane %v302_v55, 1  ;;  %v309_v58 = vadd.f32 %v308_v56, %v307_v54 }
 0x24b   :  { %v304_v59 = vadd.f32 %v303_v57, %v302_v55  ;;  %v310_v60 = vrot.slane %v309_v58, 1 }
 0x24d   :  { %v311_v61 = vadd.f32 %v310_v60, %v309_v58  ;;  %v312_v0 = vmul.f32 0.125, %v304_v59 }
 0x24f   :  { %v313_v62 = vmul.f32 0.125, %v311_v61  ;;  %v314_v63 = vmul.f32 %v312_v0, %v312_v0 }
 0x251   :  { %v315_v1 = vsub.f32 %v313_v62, %v314_v63 }
 0x253   :  { %v316_v2 = vmax.f32 %v315_v1, 0.0 }
 0x255   :  { %v318_v3 = vadd.f32 1e-05, %v316_v2 }
 0x257   :  { %691 = vrsqrt.f32 %v318_v3 }
 0x261   :  { %v692_v5 = vpop.eup %691 }
 0x262   :  { %v320_v6 = vmul.f32 %v692_v5, %v317_v4 }
 0x264   :  { %v322_v8 = vmul.f32 %v320_v6, %v312_v0  ;;  %v328_v9 = vrot.slane %v320_v6, %v951_v12 }
 0x266   :  { %v323_v10 = vsub.f32 %v321_v7, %v322_v8  ;;  %v330_v11 = vmul.f32 %v328_v9, %v295_v47 }
 0x268   :  { %v335_v13 = vrot.slane %v323_v10, %v951_v12 }
 0x26a   :  { %v337_v14 = vadd.f32 %v335_v13, %v330_v11 }
 0x26c   :  { %v338_v15 = vmax.f32 %v337_v14, 0.0 }
 0x26e   :  { %605 = vmatmul.mubr.f32.vlgmr.msra.gmra.mrb[2].mxu0 %v338_v15 }
 0x341   :  { %v428_v17 = vpop.f32.mrb[2].mxu0 }
 0x342   :  { %v429_v18 = vadd.f32 %v450_v16, %v428_v17  ;;  %v606_v19 = vpop.f32.mrb[3].mxu0 }
 0x344   :  { %432 = vst [vmem:[#allocation10] sm:$0xff] %v429_v18 }
 0x345   :  { %792 = shalt.err (!%p789_p8)
}
 0x346   :  { %s793_s0 = scalar_lea.hbm %s997_s9, 128 }
 0x347   :  { %p794_p9 = scmp.ne.s32.totalorder %s997_s9, %s793_s0  ;;  %p797_p10 = scmp.lt.u32.totalorder %s793_s0, %s997_s9 }
 0x349   :  { %p799_p11 = pnand %p797_p10, %p794_p9 }
 0x34b   :  { %802 = shalt.err (!%p799_p11)
}
 0x34c   :  { %442 = dma.vmem_to_hbm [thread:$0]  %s440_s22, 128, %s997_s9, [#allocation4]  }
 0x34d   :  { %809 = dma.done.wait [#allocation4], 128  }
 0x34e   :  { %810 = vsyncadd [#allocation4], 4294967168 }
 0x34f   :  { %446 = vsyncpa [#allocation3], 1 }
 0x350   :  { %447 = vsyncpa [#allocation6], 1 }
 0x351   :  { %448 = vsyncpa [#allocation9], 1 }
 0x352   :  { %449 = vsyncpa [#allocation4], 1 }

</bundles_post_ra>
